<compile_context>
chip_gen: v7x
topology: tpu7x:2x2x1
jax: 0.10.0
libtpu: 0.0.40
codegen_flags: <defaults>
</compile_context>

<pallas_src>
import jax
import jax.numpy as jnp
from jax.experimental import pallas as pl
from jax.experimental.pallas import tpu as pltpu


def _round_up(x, m):
    return ((x + m - 1) // m) * m


def _tpu_vmem_capacity_bytes():
    try:
        return int(pltpu.get_tpu_info().vmem_capacity_bytes)
    except Exception:
        return 64 * 1024 * 1024  # conservative (v7x-sized) fallback


def _pick_tm(T, vmem_cap_bytes):
    # Big-VMEM parts (v5e/v6e: 128 MiB) can afford tm up to 512 for large-T
    # prefill; on 64 MiB parts (v7x) stay at 256 to keep double-buffering alive.
    tm_max = 512 if vmem_cap_bytes >= 96 * 1024 * 1024 else 256
    Ta = _round_up(T, 8)
    if Ta <= tm_max:
        return Ta
    cands = [c for c in (512, 384, 256, 192, 128) if c <= tm_max]
    # minimize padded (thrown-away) token rows; break ties toward larger tiles
    return min(cands, key=lambda c: (_round_up(T, c) - T, -c))


def _ffn_kernel(x_ref, wgv_ref, wproj_ref, o_ref, acc_ref):
    # x_ref:     (tm, Hp)       bf16 token row tile (block index invariant in k)
    # wgv_ref:   (Hp, 2*tk)     fused [gate cols of K tile k | value cols of K tile k]
    # wproj_ref: (tk, Hp)       down-projection rows of K tile k
    # o_ref:     (tm, Hp)       output row tile (written once, at k == nk-1)
    # acc_ref:   (tm, Hp) f32   accumulator over the intermediate (K) axis
    k = pl.program_id(1)
    nk = pl.num_programs(1)
    tk = wproj_ref.shape[0]

    @pl.when(k == 0)
    def _():
        acc_ref[...] = jnp.zeros_like(acc_ref)

    # One MXU contraction covers both the gate and value columns of this K tile.
    hv = jnp.dot(x_ref[...], wgv_ref[...],
                 preferred_element_type=jnp.float32)      # (tm, 2*tk) f32
    h = hv[:, :tk]
    v = hv[:, tk:]
    g = (h * jax.nn.sigmoid(h)) * v                        # SiLU epilogue in f32 (EUP)

    acc_ref[...] += jnp.dot(g.astype(wproj_ref.dtype), wproj_ref[...],
                            preferred_element_type=jnp.float32)

    @pl.when(k == nk - 1)
    def _():
        o_ref[...] = acc_ref[...].astype(o_ref.dtype)


def prepare_ffn_weights(w_fc, w_v, w_proj, *, tk=512, compute_dtype=jnp.bfloat16):
    """One-time packing of the SwiGLU weights for `feed_forward`.

    w_fc, w_v: (H, I); w_proj: (I, H)  (i.e. nn.Linear weights transposed).
    Pads H/I to lane multiples and interleaves gate & value columns per K tile
    so the kernel issues a single fused up-projection per tile.
    """
    H, I = w_fc.shape
    assert w_v.shape == (H, I) and w_proj.shape == (I, H)
    cd = jnp.dtype(compute_dtype)

    Hp = _round_up(H, 128)
    tk = min(tk, _round_up(I, 128))           # tk stays a multiple of 128
    Ip = _round_up(I, tk)
    nk = Ip // tk

    def pad2(w, rows, cols):
        w = w.astype(cd)
        if w.shape == (rows, cols):
            return w
        return jnp.zeros((rows, cols), cd).at[:w.shape[0], :w.shape[1]].set(w)

    wfc_p = pad2(w_fc, Hp, Ip)
    wv_p = pad2(w_v, Hp, Ip)
    wproj_p = pad2(w_proj, Ip, Hp)

    # Fuse gate + value, interleaved per K tile: column block k (width 2*tk)
    # holds [gate columns of tile k | value columns of tile k].
    w_gv = jnp.concatenate(
        [wfc_p.reshape(Hp, nk, tk), wv_p.reshape(Hp, nk, tk)], axis=2
    ).reshape(Hp, 2 * Ip)

    return dict(w_gv=w_gv, w_proj=wproj_p, H=H, I=I, Hp=Hp, Ip=Ip, tk=tk,
                compute_dtype=cd)


def feed_forward(x, weights, *, tm=None, out_dtype=None):
    """LLaMA SwiGLU FFN:  c_proj(silu(c_fc(x)) * v_proj(x)) on a (T, H) slab.

    `weights` is the dict returned by prepare_ffn_weights (padded + fused,
    prepared once, not per call).
    """
    T, H = x.shape
    assert H == weights["H"], "hidden size mismatch with prepared weights"
    Hp, Ip, tk = weights["Hp"], weights["Ip"], weights["tk"]
    cd = weights["compute_dtype"]
    out_dtype = x.dtype if out_dtype is None else out_dtype

    vmem_cap = _tpu_vmem_capacity_bytes()
    if tm is None:
        tm = _pick_tm(T, vmem_cap)
    tm = min(tm, _round_up(T, 8))
    Tp = _round_up(T, tm)
    nm, nk = Tp // tm, Ip // tk

    # Skip the activation repack when already tile-aligned (true for real
    # LLaMA hidden sizes and tm-multiple token counts).
    if x.shape == (Tp, Hp) and x.dtype == cd:
        xp = x
    else:
        xp = jnp.zeros((Tp, Hp), cd).at[:T, :H].set(x.astype(cd))

    w_gv, wproj_p = weights["w_gv"], weights["w_proj"]

    wd = jnp.dtype(cd).itemsize
    cost = pl.CostEstimate(
        flops=2 * Tp * Hp * (2 * Ip) + 2 * Tp * Ip * Hp,
        transcendentals=Tp * Ip,
        bytes_accessed=(nm * (w_gv.size + wproj_p.size) + xp.size) * wd
                       + Tp * Hp * jnp.dtype(out_dtype).itemsize,
    )

    out = pl.pallas_call(
        _ffn_kernel,
        out_shape=jax.ShapeDtypeStruct((Tp, Hp), out_dtype),
        grid=(nm, nk),
        in_specs=[
            pl.BlockSpec((tm, Hp), lambda i, k: (i, 0)),      # x row tile (no re-DMA over k)
            pl.BlockSpec((Hp, 2 * tk), lambda i, k: (0, k)),  # fused gate|value of tile k
            pl.BlockSpec((tk, Hp), lambda i, k: (k, 0)),      # down-projection rows of tile k
        ],
        out_specs=pl.BlockSpec((tm, Hp), lambda i, k: (i, 0)),
        scratch_shapes=[pltpu.VMEM((tm, Hp), jnp.float32)],   # K accumulator
        compiler_params=pltpu.CompilerParams(
            # Token tiles are independent ("parallel" -> megacore / 2-TC split
            # on v7x); K is the reduction and carries the accumulator.
            dimension_semantics=("parallel", "arbitrary"),
            # ~96 MiB on 128 MiB parts (v5e/v6e), ~48 MiB on v7x's 64 MiB.
            vmem_limit_bytes=int(vmem_cap * 3 // 4),
        ),
        cost_estimate=cost,
    )(xp, w_gv, wproj_p)

    if (Tp, Hp) == (T, H):
        return out
    return out[:T, :H]


def feed_forward_ref(x, w_fc, w_v, w_proj):
    h = x @ w_fc
    v = x @ w_v
    g = (h * jax.nn.sigmoid(h)) * v
    return g @ w_proj


if __name__ == "__main__":
    # config (matches the PyTorch FeedForward: intermediate = int(4*H*2/3))
    batch, seq, hidden = 2, 8, 32
    intermediate = int(4 * hidden * (2 / 3))  # = 85

    key = jax.random.PRNGKey(0)
    kx, k1, k2, k3 = jax.random.split(key, 4)

    # deterministic parameter init (nn.Linear-ish uniform scale), stored (in, out)
    def init_linear(k, fan_in, fan_out):
        bound = 1.0 / (fan_in ** 0.5)
        return jax.random.uniform(k, (fan_in, fan_out), jnp.float32,
                                  minval=-bound, maxval=bound)

    x = jax.random.normal(kx, (batch, seq, hidden), jnp.float32)
    w_fc = init_linear(k1, hidden, intermediate)     # c_fc.weight.T
    w_v = init_linear(k2, hidden, intermediate)      # v_proj.weight.T
    w_proj = init_linear(k3, intermediate, hidden)   # c_proj.weight.T

    # one-time weight packing (hoisted out of the per-call path)
    packed = prepare_ffn_weights(w_fc, w_v, w_proj)

    # flatten (batch, seq) -> tokens: one lane-dense token slab per call
    x2d = x.reshape(batch * seq, hidden)

    out2d = feed_forward(x2d, packed)
    out = out2d.reshape(batch, seq, hidden)
    jax.block_until_ready(out)

    # correctness vs pure-JAX f32 reference (kernel matmuls run in bf16 with
    # f32 accumulation, so tolerance is relaxed accordingly)
    ref = feed_forward_ref(x2d, w_fc, w_v, w_proj).reshape(batch, seq, hidden)
    assert jnp.allclose(out, ref, atol=2e-2, rtol=2e-2), "mismatch vs reference"

    # TODO(synk): embedding lookup, RoPE attention, RMSNorm and the tied
    # lm_head of the full LLAMA forward remain in plain JAX; only the
    # FeedForward (SwiGLU) block is kernelized here.

    print("KERNEL_OK")
</pallas_src>

<mosaic_0001>
module attributes {stable_mosaic.version = 11 : i64} {
  func.func @_ffn_kernel(%arg0: i32, %arg1: i32, %arg2: memref<16x128xbf16, #tpu.memory_space<vmem>>, %arg3: memref<128x256xbf16, #tpu.memory_space<vmem>>, %arg4: memref<128x128xbf16, #tpu.memory_space<vmem>>, %arg5: memref<16x128xf32, #tpu.memory_space<vmem>>, %arg6: memref<16x128xf32, #tpu.memory_space<vmem>>) attributes {dimension_semantics = [#tpu.dimension_semantics<parallel>, #tpu.dimension_semantics<arbitrary>], iteration_bounds = array<i64: 1, 1>, scalar_prefetch = 0 : i64, scratch_operands = 1 : i64, tpu.core_type = #tpu.core_type<tc>, window_params = [{transform_indices = @transform_0, window_bounds = array<i64: 16, 128>}, {transform_indices = @transform_1, window_bounds = array<i64: 128, 256>}, {transform_indices = @transform_2, window_bounds = array<i64: 128, 128>}, {transform_indices = @transform_3, window_bounds = array<i64: 16, 128>}]} {
    %c0_i32 = arith.constant 0 : i32
    %0 = arith.cmpi eq, %arg1, %c0_i32 : i32
    %1 = arith.extui %0 : i1 to i32
    %c0_i32_0 = arith.constant 0 : i32
    %2 = arith.cmpi ne, %1, %c0_i32_0 : i32
    scf.if %2 {
      %cst_14 = arith.constant 0.000000e+00 : f32
      %24 = vector.broadcast %cst_14 : f32 to vector<16x128xf32>
      %c0_15 = arith.constant 0 : index
      %c0_16 = arith.constant 0 : index
      %25 = vector.load %arg6[%c0_15, %c0_16] : memref<16x128xf32, #tpu.memory_space<vmem>>, vector<16x128xf32>
      tpu.vector_store %arg6[%c0_15, %c0_16], %24 {strides = array<i32>} : memref<16x128xf32, #tpu.memory_space<vmem>>, vector<16x128xf32>,
    } else {
    }
    %c0 = arith.constant 0 : index
    %c0_1 = arith.constant 0 : index
    %3 = vector.load %arg2[%c0, %c0_1] : memref<16x128xbf16, #tpu.memory_space<vmem>>, vector<16x128xbf16>
    %c0_2 = arith.constant 0 : index
    %c0_3 = arith.constant 0 : index
    %4 = vector.load %arg3[%c0_2, %c0_3] : memref<128x256xbf16, #tpu.memory_space<vmem>>, vector<128x256xbf16>
    %cst = arith.constant dense<0.000000e+00> : vector<16x256xf32>
    %5 = tpu.matmul %3, %4, %cst {dimension_numbers = #tpu.dot_dimension_numbers<[1], [0], [0], [1], [0, 0, 1, 1], [], []>} : vector<16x128xbf16>, vector<128x256xbf16>, vector<16x256xf32> -> vector<16x256xf32>
    %6 = vector.extract_strided_slice %5 {offsets = [0, 0], sizes = [16, 128], strides = [1, 1]} : vector<16x256xf32> to vector<16x128xf32>
    %7 = vector.extract_strided_slice %5 {offsets = [0, 128], sizes = [16, 128], strides = [1, 1]} : vector<16x256xf32> to vector<16x128xf32>
    %8 = arith.negf %6 : vector<16x128xf32>
    %9 = math.exp %8 : vector<16x128xf32>
    %cst_4 = arith.constant 1.000000e+00 : f32
    %10 = vector.broadcast %cst_4 : f32 to vector<16x128xf32>
    %11 = arith.addf %10, %9 : vector<16x128xf32>
    %12 = arith.divf %10, %11 : vector<16x128xf32>
    %13 = arith.mulf %6, %12 : vector<16x128xf32>
    %14 = arith.mulf %13, %7 : vector<16x128xf32>
    %c0_5 = arith.constant 0 : index
    %c0_6 = arith.constant 0 : index
    %15 = vector.load %arg6[%c0_5, %c0_6] : memref<16x128xf32, #tpu.memory_space<vmem>>, vector<16x128xf32>
    %16 = arith.truncf %14 : vector<16x128xf32> to vector<16x128xbf16>
    %c0_7 = arith.constant 0 : index
    %c0_8 = arith.constant 0 : index
    %17 = vector.load %arg4[%c0_7, %c0_8] : memref<128x128xbf16, #tpu.memory_space<vmem>>, vector<128x128xbf16>
    %cst_9 = arith.constant dense<0.000000e+00> : vector<16x128xf32>
    %18 = tpu.matmul %16, %17, %cst_9 {dimension_numbers = #tpu.dot_dimension_numbers<[1], [0], [0], [1], [0, 0, 1, 1], [], []>} : vector<16x128xbf16>, vector<128x128xbf16>, vector<16x128xf32> -> vector<16x128xf32>
    %19 = arith.addf %15, %18 : vector<16x128xf32>
    %c0_10 = arith.constant 0 : index
    %c0_11 = arith.constant 0 : index
    %20 = vector.load %arg6[%c0_10, %c0_11] : memref<16x128xf32, #tpu.memory_space<vmem>>, vector<16x128xf32>
    tpu.vector_store %arg6[%c0_10, %c0_11], %19 {strides = array<i32>} : memref<16x128xf32, #tpu.memory_space<vmem>>, vector<16x128xf32>,
    %c0_i32_12 = arith.constant 0 : i32
    %21 = arith.cmpi eq, %arg1, %c0_i32_12 : i32
    %22 = arith.extui %21 : i1 to i32
    %c0_i32_13 = arith.constant 0 : i32
    %23 = arith.cmpi ne, %22, %c0_i32_13 : i32
    scf.if %23 {
      %c0_14 = arith.constant 0 : index
      %c0_15 = arith.constant 0 : index
      %24 = vector.load %arg6[%c0_14, %c0_15] : memref<16x128xf32, #tpu.memory_space<vmem>>, vector<16x128xf32>
      %c0_16 = arith.constant 0 : index
      %c0_17 = arith.constant 0 : index
      %25 = vector.load %arg5[%c0_16, %c0_17] : memref<16x128xf32, #tpu.memory_space<vmem>>, vector<16x128xf32>
      tpu.vector_store %arg5[%c0_16, %c0_17], %24 {strides = array<i32>} : memref<16x128xf32, #tpu.memory_space<vmem>>, vector<16x128xf32>,
    } else {
    }
    return
  }
  func.func @transform_0(%arg0: i32, %arg1: i32) -> (i32, i32) {
    %c0_i32 = arith.constant 0 : i32
    %c0_i32_0 = arith.constant 0 : i32
    return %arg0, %c0_i32 : i32, i32
  }
  func.func @transform_1(%arg0: i32, %arg1: i32) -> (i32, i32) {
    %c0_i32 = arith.constant 0 : i32
    %c0_i32_0 = arith.constant 0 : i32
    return %c0_i32, %arg1 : i32, i32
  }
  func.func @transform_2(%arg0: i32, %arg1: i32) -> (i32, i32) {
    %c0_i32 = arith.constant 0 : i32
    %c0_i32_0 = arith.constant 0 : i32
    return %arg1, %c0_i32 : i32, i32
  }
  func.func @transform_3(%arg0: i32, %arg1: i32) -> (i32, i32) {
    %c0_i32 = arith.constant 0 : i32
    %c0_i32_0 = arith.constant 0 : i32
    return %arg0, %c0_i32 : i32, i32
  }
}

</mosaic_0001>

<bundles_post_ra>
// kernel: tpu_custom_call.1
= control target key start
LH: loop header
LB: loop body
LE: loop exit
PB: predicated region body
PF: predicated region fallthrough
CT: control target
= control target key end

     0   :  { %8 = vsyncpa [#allocation4], 0  ;;  %s650_s0 = inlined_call_operand.hbm [shape: bf16[16,128], index: 0, kind: input, shape index: {}]   ;;  %s651_s1 = inlined_call_operand.hbm [shape: bf16[128,256], index: 1, kind: input, shape index: {}]   ;;  %s652_s2 = inlined_call_operand.hbm [shape: bf16[128,128], index: 2, kind: input, shape index: {}]   ;;  %s653_s3 = inlined_call_operand.hbm [shape: f32[16,128], index: 3, kind: output, shape index: {}]  }
   0x1   :  { %9 = vsyncpa [#allocation7], 0 }
   0x2   :  { %10 = vsyncpa [#allocation5], 0  ;;  %s565_s12 = smov [#allocation6]   ;;  %s471_s16 = scalar_lea.hbm %s651_s1, 2048 }
   0x3   :  { %s28_s13 = sshll.u32 %s565_s12, 4  ;;  %p472_p0 = scmp.ne.s32.totalorder %s651_s1, %s471_s16  ;;  %s29_s13 = int_to_ptr.vmem [resolvable:$true] %s28_s13 }
   0x4   :  { %p475_p1 = scmp.lt.u32.totalorder %s471_s16, %s651_s1 }
   0x6   :  { %p477_p2 = pnand %p475_p1, %p472_p0 }
   0x8   :  { %480 = shalt.err (!%p477_p2)
}
   0x9   :  { %s481_s21 = scalar_lea.vmem %s29_s13, 2048  ;;  %p486_p4 = scmp.lt.s32.totalorder %s29_s13, %s29_s13 }
   0xa   :  { %p482_p3 = scmp.ne.s32.totalorder %s29_s13, %s481_s21  ;;  %p487_p5 = scmp.lt.s32.totalorder %s481_s21, %s481_s21 }
   0xc   :  { %p488_p6 = por %p487_p5, %p486_p4 }
   0xe   :  { %p489_p7 = pnand %p488_p6, %p482_p3 }
  0x10   :  { %492 = shalt.err (!%p489_p7)
}
  0x11   :  { %s566_s22 = smov 128   ;;  %s567_s23 = smov 8  }
  0x12   :  { %34 = dma.hbm_to_vmem [thread:$0]  %s651_s1, 2048, %s29_s13, [#allocation7], %s566_s22, %s566_s22, %s567_s23  }
  0x13   :  { %s568_s26 = smov [#allocation3]   ;;  %s493_s30 = scalar_lea.hbm %s650_s0, 128 }
  0x14   :  { %s16_s27 = sshll.u32 %s568_s26, 4  ;;  %p494_p8 = scmp.ne.s32.totalorder %s650_s0, %s493_s30  ;;  %s17_s27 = int_to_ptr.vmem [resolvable:$true] %s16_s27 }
  0x15   :  { %p497_p9 = scmp.lt.u32.totalorder %s493_s30, %s650_s0 }
  0x17   :  { %p499_p10 = pnand %p497_p9, %p494_p8 }
  0x19   :  { %502 = shalt.err (!%p499_p10)
}
  0x1a   :  { %s503_s8 = scalar_lea.vmem %s17_s27, 128  ;;  %p508_p12 = scmp.lt.s32.totalorder %s17_s27, %s17_s27 }
  0x1b   :  { %p504_p11 = scmp.ne.s32.totalorder %s17_s27, %s503_s8  ;;  %p509_p13 = scmp.lt.s32.totalorder %s503_s8, %s503_s8 }
  0x1d   :  { %p510_p0 = por %p509_p13, %p508_p12 }
  0x1f   :  { %p511_p1 = pnand %p510_p0, %p504_p11 }
  0x21   :  { %514 = shalt.err (!%p511_p1)
}
  0x22   :  { %s569_s1 = smov 64   ;;  %s570_s9 = smov 4  }
  0x23   :  { %22 = dma.hbm_to_vmem [thread:$0]  %s650_s0, 128, %s17_s27, [#allocation4], %s569_s1, %s569_s1, %s570_s9  }
  0x24   :  { %s571_s12 = smov [#allocation8]   ;;  %s515_s16 = scalar_lea.hbm %s652_s2, 1024 }
  0x25   :  { %s40_s13 = sshll.u32 %s571_s12, 4  ;;  %p516_p2 = scmp.ne.s32.totalorder %s652_s2, %s515_s16  ;;  %s41_s13 = int_to_ptr.vmem [resolvable:$true] %s40_s13 }
  0x26   :  { %p519_p3 = scmp.lt.u32.totalorder %s515_s16, %s652_s2 }
  0x28   :  { %p521_p4 = pnand %p519_p3, %p516_p2 }
  0x2a   :  { %524 = shalt.err (!%p521_p4)
}
  0x2b   :  { %s525_s21 = scalar_lea.vmem %s41_s13, 1024  ;;  %p530_p6 = scmp.lt.s32.totalorder %s41_s13, %s41_s13 }
  0x2c   :  { %p526_p5 = scmp.ne.s32.totalorder %s41_s13, %s525_s21  ;;  %p531_p7 = scmp.lt.s32.totalorder %s525_s21, %s525_s21 }
  0x2e   :  { %p532_p8 = por %p531_p7, %p530_p6 }
  0x30   :  { %p533_p9 = pnand %p532_p8, %p526_p5 }
  0x32   :  { %536 = shalt.err (!%p533_p9)
}
  0x33   :  { %46 = dma.hbm_to_vmem [thread:$0]  %s652_s2, 1024, %s41_s13, [#allocation7], %s569_s1, %s569_s1, %s570_s9  }
  0x34   :  { %559 = dma.done.wait [#allocation4], 128  }
  0x35   :  { %560 = vsyncadd [#allocation4], 4294967168 }
  0x36   :  { %561 = dma.done.wait [#allocation7], 3072  }
  0x37   :  { %562 = vsyncadd [#allocation7], 4294964224  ;;  %v572_v0 = vmov 0   ;;  %v430_v1 = vld [vmem:[#allocation6 + $0x4] ss:$8 sps:$4 sm:$0xff]   ;;  %v454_v17 = vld [vmem:[#allocation3] sm:$0xff]  }
  0x38   :  { %199 = vmatprep.mubr.bf16.mxu0 %v572_v0  ;;  %v432_v2 = vld [vmem:[#allocation6] ss:$8 sps:$4 sm:$0xff]   ;;  %167 = vmatprep.subr.bf16.mxu0 %v430_v1  ;;  %v433_v3 = vld [vmem:[#allocation6 + $0x14] ss:$8 sps:$4 sm:$0xff]   ;;  %v435_v4 = vld [vmem:[#allocation6 + $0x10] ss:$8 sps:$4 sm:$0xff]  }
  0x39   :  { %168 = vmatpush1.bf16.msra.mxu0 %v432_v2  ;;  %v436_v5 = vld [vmem:[#allocation6 + $0x24] ss:$8 sps:$4 sm:$0xff]   ;;  %v438_v6 = vld [vmem:[#allocation6 + $0x20] ss:$8 sps:$4 sm:$0xff]   ;;  %v439_v7 = vld [vmem:[#allocation6 + $0x34] ss:$8 sps:$4 sm:$0xff]  }
  0x3a   :  { %169 = vmatprep.subr.bf16.mxu0 %v433_v3  ;;  %v441_v8 = vld [vmem:[#allocation6 + $0x30] ss:$8 sps:$4 sm:$0xff]   ;;  %v442_v9 = vld [vmem:[#allocation6 + $0x44] ss:$8 sps:$4 sm:$0xff]   ;;  %v444_v10 = vld [vmem:[#allocation6 + $0x40] ss:$8 sps:$4 sm:$0xff]  }
  0x3b   :  { %v445_v11 = vld [vmem:[#allocation6 + $0x54] ss:$8 sps:$4 sm:$0xff]   ;;  %v447_v12 = vld [vmem:[#allocation6 + $0x50] ss:$8 sps:$4 sm:$0xff]   ;;  %v448_v13 = vld [vmem:[#allocation6 + $0x64] ss:$8 sps:$4 sm:$0xff]  }
  0x3c   :  { %v450_v14 = vld [vmem:[#allocation6 + $0x60] ss:$8 sps:$4 sm:$0xff]   ;;  %v451_v15 = vld [vmem:[#allocation6 + $0x74] ss:$8 sps:$4 sm:$0xff]   ;;  %v453_v16 = vld [vmem:[#allocation6 + $0x70] ss:$8 sps:$4 sm:$0xff]  }
  0x3d   :  { %170 = vmatpush1.bf16.msra.mxu0 %v435_v4  ;;  %v455_v18 = vld [vmem:[#allocation8] sm:$0xff]   ;;  %v573_v19 = vmov 0.0   ;;  %v456_v20 = vld [vmem:[#allocation8 + $0x8] sm:$0xff]   ;;  %v457_v21 = vld [vmem:[#allocation8 + $0x10] sm:$0xff]   ;;  %vm574_vm0 = vmmov 0   ;;  %s575_s2 = smov [#allocation9]  }
  0x3e   :  { %171 = vmatprep.subr.bf16.mxu0 %v436_v5  ;;  %399 = vmatprep.subr.bf16.mxu1 %v573_v19  ;;  %v458_v22 = vld [vmem:[#allocation8 + $0x18] sm:$0xff]   ;;  %v459_v23 = vld [vmem:[#allocation8 + $0x20] sm:$0xff]   ;;  %v460_v24 = vld [vmem:[#allocation8 + $0x28] sm:$0xff]   ;;  %s350_s25 = sshll.u32 %s575_s2, 4  ;;  %s351_s25 = int_to_ptr.vmem [resolvable:$true] %s350_s25 }
  0x3f   :  { %400 = vmatpush3.bf16.msra.mxu1 %v455_v18  ;;  %v461_v25 = vld [vmem:[#allocation8 + $0x30] sm:$0xff]   ;;  %v462_v26 = vld [vmem:[#allocation8 + $0x38] sm:$0xff]   ;;  %415 = vmatprep.mubr.msk.bf16.mxu1 %vm574_vm0, %v573_v19  ;;  %s537_s26 = scalar_lea.vmem %s351_s25, 256  ;;  %p542_p11 = scmp.lt.s32.totalorder %s351_s25, %s351_s25 }
  0x40   :  { %401 = vmatprep.subr.bf16.mxu1 %v573_v19  ;;  %p538_p10 = scmp.ne.s32.totalorder %s351_s25, %s537_s26  ;;  %p543_p12 = scmp.lt.s32.totalorder %s537_s26, %s537_s26 }
  0x41   :  { %172 = vmatpush1.bf16.msra.mxu0 %v438_v6 }
  0x42   :  { %173 = vmatprep.subr.bf16.mxu0 %v439_v7  ;;  %p544_p13 = por %p543_p12, %p542_p11 }
  0x43   :  { %402 = vmatpush3.bf16.msra.mxu1 %v456_v20 }
  0x44   :  { %403 = vmatprep.subr.bf16.mxu1 %v573_v19  ;;  %p545_p0 = pnand %p544_p13, %p538_p10 }
  0x45   :  { %174 = vmatpush1.bf16.msra.mxu0 %v441_v8 }
  0x46   :  { %175 = vmatprep.subr.bf16.mxu0 %v442_v9 }
  0x47   :  { %404 = vmatpush3.bf16.msra.mxu1 %v457_v21 }
  0x48   :  { %405 = vmatprep.subr.bf16.mxu1 %v573_v19 }
  0x49   :  { %176 = vmatpush1.bf16.msra.mxu0 %v444_v10 }
  0x4a   :  { %177 = vmatprep.subr.bf16.mxu0 %v445_v11 }
  0x4b   :  { %406 = vmatpush3.bf16.msra.mxu1 %v458_v22 }
  0x4c   :  { %407 = vmatprep.subr.bf16.mxu1 %v573_v19 }
  0x4d   :  { %178 = vmatpush1.bf16.msra.mxu0 %v447_v12 }
  0x4e   :  { %179 = vmatprep.subr.bf16.mxu0 %v448_v13 }
  0x4f   :  { %408 = vmatpush3.bf16.msra.mxu1 %v459_v23 }
  0x50   :  { %409 = vmatprep.subr.bf16.mxu1 %v573_v19 }
  0x51   :  { %180 = vmatpush1.bf16.msra.mxu0 %v450_v14 }
  0x52   :  { %181 = vmatprep.subr.bf16.mxu0 %v451_v15 }
  0x53   :  { %410 = vmatpush3.bf16.msra.mxu1 %v460_v24 }
  0x54   :  { %411 = vmatprep.subr.bf16.mxu1 %v573_v19 }
  0x55   :  { %182 = vmatpush1.bf16.msra.mxu0 %v453_v16 }
  0x57   :  { %412 = vmatpush3.bf16.msra.mxu1 %v461_v25 }
  0x58   :  { %200 = vmatmul.mubr.bf16.vlgmr.msra.gmra.mrb[0].mxu0 %v454_v17  ;;  %413 = vmatprep.subr.bf16.mxu1 %v573_v19 }
  0x5b   :  { %414 = vmatpush3.bf16.msra.mxu1 %v462_v26 }
 0x12b   :  { %v201_v27 = vpop.f32.mrb[0].mxu0 }
 0x12c   :  { %v380_v28 = vmul.f32 -1.442695, %v201_v27  ;;  %v203_v29 = vpop.f32.mrb[1].mxu0 }
 0x12d   :  { %v205_v30 = vpop.f32.mrb[2].mxu0 }
 0x12e   :  { %463 = vpow2.f32 %v380_v28  ;;  %v381_v31 = vmul.f32 -1.442695, %v205_v30  ;;  %v207_v32 = vpop.f32.mrb[3].mxu0 }
 0x130   :  { %465 = vpow2.f32 %v381_v31 }
 0x138   :  { %v464_v33 = vpop.eup %463 }
 0x139   :  { %v216_v34 = vadd.f32 1.0, %v464_v33 }
 0x13a   :  { %v466_v35 = vpop.eup %465 }
 0x13b   :  { %467 = vrcp.f32 %v216_v34  ;;  %v217_v36 = vadd.f32 1.0, %v466_v35 }
 0x13d   :  { %469 = vrcp.f32 %v217_v36 }
 0x145   :  { %v468_v37 = vpop.eup %467 }
 0x146   :  { %v222_v38 = vmul.f32 %v468_v37, %v201_v27 }
 0x147   :  { %v470_v39 = vpop.eup %469 }
 0x148   :  { %v224_v40 = vmul.f32 %v222_v38, %v203_v29  ;;  %v223_v41 = vmul.f32 %v470_v39, %v205_v30 }
 0x14a   :  { %v225_v42 = vmul.f32 %v223_v41, %v207_v32 }
 0x14c   :  { %v228_v43 = vpack.c.bf16 %v225_v42, %v224_v40 }
 0x14e   :  { %416 = vmatmul.mubr.bf16.vlgmr.msra.gmra.mrb[0].mxu1 %v228_v43 }
 0x221   :  { %v327_v44 = vpop.f32.mrb[0].mxu1 }
 0x222   :  { %343 = vst [vmem:[#allocation9] sm:$0xff] %v327_v44  ;;  %v417_v45 = vpop.f32.mrb[1].mxu1 }
 0x223   :  { %v330_v46 = vpop.f32.mrb[2].mxu1 }
 0x224   :  { %344 = vst [vmem:[#allocation9 + $0x8] sm:$0xff] %v330_v46  ;;  %v418_v47 = vpop.f32.mrb[3].mxu1 }
 0x225   :  { %548 = shalt.err (!%p545_p0)
}
 0x226   :  { %s549_s29 = scalar_lea.hbm %s653_s3, 256 }
 0x227   :  { %p550_p1 = scmp.ne.s32.totalorder %s653_s3, %s549_s29  ;;  %p553_p2 = scmp.lt.u32.totalorder %s549_s29, %s653_s3 }
 0x229   :  { %p555_p3 = pnand %p553_p2, %p550_p1 }
 0x22b   :  { %558 = shalt.err (!%p555_p3)
}
 0x22c   :  { %356 = dma.vmem_to_hbm [thread:$0]  %s351_s25, 256, %s653_s3, [#allocation5], %s566_s22, %s566_s22, %s567_s23  }
 0x22d   :  { %563 = dma.done.wait [#allocation5], 256  }
 0x22e   :  { %564 = vsyncadd [#allocation5], 4294967040 }
 0x22f   :  { %360 = vsyncpa [#allocation4], 1 }
 0x230   :  { %361 = vsyncpa [#allocation7], 1 }
 0x231   :  { %362 = vsyncpa [#allocation5], 1 }

</bundles_post_ra>
